<compile_context>
chip_gen: v6e
topology: v6e:2x2x1
jax: 0.10.0
libtpu: 0.0.40
codegen_flags: <defaults>
</compile_context>

<pallas_src>
import numpy as np
import jax
import jax.numpy as jnp
from jax.experimental import pallas as pl
from jax.experimental.pallas import tpu as pltpu

_TWO_PI = 2.0 * np.pi


def _round_up(n, unit):
    return ((n + unit - 1) // unit) * unit


# ------------------------------------------------------------------
# Kernel 1: row-major prompt encoding  (M, 2) -> (M, 2*F2)
# ------------------------------------------------------------------
def _coord_encode_kernel(xy_ref, gm_ref, bias_ref, out_ref):
    # xy_ref  : (TM, 2)     f32   (x, y) per row
    # gm_ref  : (2, F2)     f32   pre-scaled by 4*pi
    # bias_ref: (1, F2)     f32   -2*pi * (G[0] + G[1])
    # out_ref : (TM, 2*F2)  f32
    f2 = gm_ref.shape[1]
    x = xy_ref[:, 0:1]                       # (TM, 1)
    y = xy_ref[:, 1:2]                       # (TM, 1)
    enc = x * gm_ref[0:1, :] + y * gm_ref[1:2, :] + bias_ref[...]   # (TM, F2) VPU FMAs
    # Stores are lane-aligned whenever F2 % 128 == 0 (true for default output_channels=256);
    # other configs remain correct, just use masked stores.
    out_ref[:, :f2] = jnp.sin(enc).astype(out_ref.dtype)
    out_ref[:, f2:] = jnp.cos(enc).astype(out_ref.dtype)


def _pick_rows_tile(m, *, min_split=512, max_tile=1024):
    """Single grid step for small prompt batches; only split when each step has real work."""
    m_up = _round_up(max(m, 1), 8)
    if m_up <= min_split:
        return m_up, m_up
    half = _round_up((m_up + 1) // 2, 8)
    tile = max(8, min(max_tile, half))
    return tile, _round_up(m_up, tile)


def _encode_rows(xy_flat, gm_eff, bias_row):
    """xy_flat: (M, 2) f32 -> (M, 2*F2) f32."""
    M = xy_flat.shape[0]
    F2 = gm_eff.shape[1]
    tile_m, m_pad = _pick_rows_tile(M)
    if m_pad != M:
        xy_flat = jnp.pad(xy_flat, ((0, m_pad - M), (0, 0)))

    out = pl.pallas_call(
        _coord_encode_kernel,
        out_shape=jax.ShapeDtypeStruct((m_pad, 2 * F2), jnp.float32),
        grid_spec=pltpu.PrefetchScalarGridSpec(
            num_scalar_prefetch=0,
            grid=(m_pad // tile_m,),
            in_specs=[
                pl.BlockSpec((tile_m, 2), lambda i: (i, 0)),
                pl.BlockSpec((2, F2), lambda i: (0, 0)),
                pl.BlockSpec((1, F2), lambda i: (0, 0)),
            ],
            out_specs=pl.BlockSpec((tile_m, 2 * F2), lambda i: (i, 0)),
        ),
        compiler_params=pltpu.CompilerParams(dimension_semantics=("parallel",)),
    )(xy_flat, gm_eff, bias_row)
    return out[:M] if m_pad != M else out


# ------------------------------------------------------------------
# Kernel 2: separable grid encoding -> (2*F2, H, W)  (NCHW sans batch)
#   sin(A+B)/cos(A+B) combine of tiny precomputed tables: pure VPU, store-bound.
# ------------------------------------------------------------------
def _grid_separable_kernel(sa_ref, ca_ref, sb_ref, cb_ref, out_ref):
    # sa_ref/ca_ref: (F2, 1, W)    sin/cos of x-dependent angle A(f, w)
    # sb_ref/cb_ref: (F2, TH, 1)   sin/cos of y-dependent angle B(f, h)
    # out_ref      : (2*F2, TH, W)
    f2 = sb_ref.shape[0]
    th = sb_ref.shape[1]
    w = sa_ref.shape[2]
    shape = (f2, th, w)
    sa = jnp.broadcast_to(sa_ref[...], shape)
    ca = jnp.broadcast_to(ca_ref[...], shape)
    sb = jnp.broadcast_to(sb_ref[...], shape)
    cb = jnp.broadcast_to(cb_ref[...], shape)
    # Angle-addition identities: 4 mul + 2 add per output element, no transcendentals.
    out_ref[:f2] = (sa * cb + ca * sb).astype(out_ref.dtype)
    out_ref[f2:] = (ca * cb - sa * sb).astype(out_ref.dtype)


def _pick_grid_h_tile(h, f2, w, *, out_block_budget=2 << 20):
    """Rows of H per grid step, sized so double-buffered blocks stay well inside
    v5e's 16 MiB default scoped VMEM (also trivially fine on v6e/v7x)."""
    w_vmem = _round_up(max(w, 1), 128)           # lane padding of the VMEM tile
    row_bytes = 2 * f2 * w_vmem * 4
    max_rows = max(8, ((out_block_budget // row_bytes) // 8) * 8)
    if h <= max_rows:
        return h, h                              # single grid step, no padding
    th = max_rows
    return th, _round_up(h, th)


def _encode_grid_nchw(x_vals, y_vals, gm_eff, bias_row):
    """x_vals: (W,), y_vals: (H,) normalized coords -> (2*F2, H, W) f32."""
    F2 = gm_eff.shape[1]
    W = x_vals.shape[0]
    H = y_vals.shape[0]
    gx = gm_eff[0][:, None]                      # (F2, 1) = 4*pi*G[0]
    gy = gm_eff[1][:, None]                      # (F2, 1) = 4*pi*G[1]
    bias = bias_row[0][:, None]                  # (F2, 1) = -2*pi*(G[0]+G[1])
    a = gx * x_vals[None, :] + bias              # (F2, W)
    b = gy * y_vals[None, :]                     # (F2, H)
    # Tiny transcendental tables (2*F2*(H+W) sin/cos), computed by XLA outside the kernel.
    sa = jnp.sin(a)[:, None, :]                  # (F2, 1, W)
    ca = jnp.cos(a)[:, None, :]
    sb = jnp.sin(b)[:, :, None]                  # (F2, H, 1)
    cb = jnp.cos(b)[:, :, None]

    tile_h, h_pad = _pick_grid_h_tile(H, F2, W)
    if h_pad != H:
        sb = jnp.pad(sb, ((0, 0), (0, h_pad - H), (0, 0)))
        cb = jnp.pad(cb, ((0, 0), (0, h_pad - H), (0, 0)))

    out = pl.pallas_call(
        _grid_separable_kernel,
        out_shape=jax.ShapeDtypeStruct((2 * F2, h_pad, W), jnp.float32),
        grid_spec=pltpu.PrefetchScalarGridSpec(
            num_scalar_prefetch=0,
            grid=(h_pad // tile_h,),
            in_specs=[
                pl.BlockSpec((F2, 1, W), lambda i: (0, 0, 0)),
                pl.BlockSpec((F2, 1, W), lambda i: (0, 0, 0)),
                pl.BlockSpec((F2, tile_h, 1), lambda i: (0, i, 0)),
                pl.BlockSpec((F2, tile_h, 1), lambda i: (0, i, 0)),
            ],
            out_specs=pl.BlockSpec((2 * F2, tile_h, W), lambda i: (0, i, 0)),
        ),
        compiler_params=pltpu.CompilerParams(dimension_semantics=("parallel",)),
    )(sa, ca, sb, cb)
    return out[:, :H, :] if h_pad != H else out


# ------------------------------------------------------------------
# Module-equivalent wrapper (plain-JAX glue around the kernels)
# ------------------------------------------------------------------
class SAMV1CoordinateEncoder:
    def __init__(self, output_channels, key, scale=1.0):
        num_coords = 2
        f2 = output_channels // num_coords
        # Matches the original SAM init: scale * randn (scale defaults to 1).
        gm = scale * jax.random.normal(key, (num_coords, f2), dtype=jnp.float32)
        self.gaussian_matrix = gm
        self.output_channels = output_channels
        self.num_features = 2 * f2
        # Fold "2*xy - 1" and "* 2*pi" into the weights:
        #   enc = xy @ (4*pi*G) + (-2*pi * sum(G, axis=0))
        self.gm_eff = (2.0 * _TWO_PI) * gm                                   # (2, F2)
        self.bias_row = (-_TWO_PI) * jnp.sum(gm, axis=0, keepdims=True)      # (1, F2)
        # TODO(synk): Python-side cache mirrors the module's non-persistent buffer;
        # it is not jit/trace-safe - call get_grid_position_encoding outside jit.
        self._grid_posenc = None
        self._grid_cache_key = None

    def forward(self, *xy_norm_coords_tensors):
        results = [None] * len(xy_norm_coords_tensors)
        entries, flats = [], []
        for idx, xy in enumerate(xy_norm_coords_tensors):
            if xy is None:
                continue
            xy = jnp.asarray(xy, dtype=jnp.float32)
            lead = xy.shape[:-1]
            m = int(np.prod(lead)) if lead else 1
            if m == 0:
                results[idx] = jnp.zeros((*lead, self.num_features), jnp.float32)
                continue
            entries.append((idx, lead, m))
            flats.append(xy.reshape(m, 2))

        if flats:
            # Batch every prompt tensor into a single (usually single-step) pallas_call.
            # TODO(synk): for very large prompt batches (M >> 512) a feature-major
            # (2, M) layout would be lane-dense; SAM prompt counts never get there.
            all_xy = flats[0] if len(flats) == 1 else jnp.concatenate(flats, axis=0)
            enc = _encode_rows(all_xy, self.gm_eff, self.bias_row)
            off = 0
            for idx, lead, m in entries:
                results[idx] = enc[off:off + m].reshape(*lead, self.num_features)
                off += m

        return results if len(results) > 1 else results[0]

    __call__ = forward

    @staticmethod
    def _grid_axis_coords(h, w):
        half_h, half_w = 0.5 / h, 0.5 / w
        x_vals = jnp.linspace(half_w, 1.0 - half_w, w, dtype=jnp.float32)
        y_vals = jnp.linspace(half_h, 1.0 - half_h, h, dtype=jnp.float32)
        return x_vals, y_vals

    def create_grid_xy_coordinates(self, grid_hw):
        h, w = grid_hw
        x_vals, y_vals = self._grid_axis_coords(h, w)
        x_grid = jnp.tile(x_vals[None, :], (h, 1))            # (H, W)
        y_grid = jnp.tile(y_vals[:, None], (1, w))            # (H, W)
        return jnp.stack([x_grid, y_grid], axis=-1)           # (H, W, 2)

    def get_grid_position_encoding(self, patch_grid_hw):
        h, w = int(patch_grid_hw[0]), int(patch_grid_hw[1])
        key = (h, w)
        if self._grid_cache_key != key:
            x_vals, y_vals = self._grid_axis_coords(h, w)
            enc = _encode_grid_nchw(x_vals, y_vals, self.gm_eff, self.bias_row)
            self._grid_posenc = enc[None]                     # (1, F, H, W): free reshape
            self._grid_cache_key = key
        return self._grid_posenc


# ------------------------------------------------------------------
# Float64 numpy reference (matches the PyTorch math exactly)
# ------------------------------------------------------------------
def _reference_forward_np(xy, gaussian_matrix_f64):
    xy = 2.0 * np.asarray(xy, np.float64) - 1.0
    enc = (xy @ gaussian_matrix_f64) * (2.0 * np.pi)
    return np.concatenate([np.sin(enc), np.cos(enc)], axis=-1)


if __name__ == "__main__":
    key = jax.random.PRNGKey(0)
    k_gm, k_pts, k_box = jax.random.split(key, 3)

    output_channels = 256
    encoder = SAMV1CoordinateEncoder(output_channels, k_gm)

    # Point prompts: (B, N, 2); box prompts: (B, N, 2, 2)
    points = jax.random.uniform(k_pts, (2, 8, 2), dtype=jnp.float32)
    boxes = jax.random.uniform(k_box, (2, 4, 2, 2), dtype=jnp.float32)

    pts_enc, box_enc = encoder(points, boxes)      # one batched pallas_call
    pts_enc = jax.block_until_ready(pts_enc)
    box_enc = jax.block_until_ready(box_enc)

    # Grid positional encoding (16x16 patch grid): single grid step -> (1, F, 16, 16).
    grid_posenc = jax.block_until_ready(encoder.get_grid_position_encoding((16, 16)))
    # Larger non-square grid exercises the tiled + H-padded path (TH=16, H padded 24->32).
    grid_posenc_big = jax.block_until_ready(encoder.get_grid_position_encoding((24, 40)))

    assert pts_enc.shape == (2, 8, output_channels)
    assert box_enc.shape == (2, 4, 2, output_channels)
    assert grid_posenc.shape == (1, output_channels, 16, 16)
    assert grid_posenc_big.shape == (1, output_channels, 24, 40)

    # None passthrough (matches the PyTorch module).
    assert encoder(None) is None

    # Verify against a float64 reference of the original math.
    gm64 = np.asarray(encoder.gaussian_matrix, np.float64)
    ref_pts = _reference_forward_np(np.asarray(points), gm64)
    ref_box = _reference_forward_np(np.asarray(boxes), gm64)
    ref_grid = np.transpose(
        _reference_forward_np(np.asarray(encoder.create_grid_xy_coordinates((16, 16))), gm64),
        (2, 0, 1))[None]
    ref_grid_big = np.transpose(
        _reference_forward_np(np.asarray(encoder.create_grid_xy_coordinates((24, 40))), gm64),
        (2, 0, 1))[None]

    np.testing.assert_allclose(np.asarray(pts_enc), ref_pts, rtol=1e-4, atol=2e-4)
    np.testing.assert_allclose(np.asarray(box_enc), ref_box, rtol=1e-4, atol=2e-4)
    np.testing.assert_allclose(np.asarray(grid_posenc), ref_grid, rtol=1e-4, atol=2e-4)
    np.testing.assert_allclose(np.asarray(grid_posenc_big), ref_grid_big, rtol=1e-4, atol=2e-4)

    print("KERNEL_OK")
</pallas_src>

<mosaic_0001>
module attributes {stable_mosaic.version = 11 : i64} {
  func.func @_coord_encode_kernel(%arg0: i32, %arg1: memref<32x2xf32, #tpu.memory_space<vmem>>, %arg2: memref<2x128xf32, #tpu.memory_space<vmem>>, %arg3: memref<1x128xf32, #tpu.memory_space<vmem>>, %arg4: memref<32x256xf32, #tpu.memory_space<vmem>>) attributes {dimension_semantics = [#tpu.dimension_semantics<parallel>], iteration_bounds = array<i64: 1>, scalar_prefetch = 0 : i64, scratch_operands = 0 : i64, tpu.core_type = #tpu.core_type<tc>, window_params = [{transform_indices = @transform_0, window_bounds = array<i64: 32, 2>}, {pipeline_mode = #tpu.pipeline_mode<synchronous>, transform_indices = @transform_1, window_bounds = array<i64: 2, 128>}, {pipeline_mode = #tpu.pipeline_mode<synchronous>, transform_indices = @transform_2, window_bounds = array<i64: 1, 128>}, {transform_indices = @transform_3, window_bounds = array<i64: 32, 256>}]} {
    %c0 = arith.constant 0 : index
    %c0_0 = arith.constant 0 : index
    %0 = vector.load %arg1[%c0, %c0_0] : memref<32x2xf32, #tpu.memory_space<vmem>>, vector<32x1xf32>
    %c0_1 = arith.constant 0 : index
    %c1 = arith.constant 1 : index
    %1 = vector.load %arg1[%c0_1, %c1] : memref<32x2xf32, #tpu.memory_space<vmem>>, vector<32x1xf32>
    %c0_2 = arith.constant 0 : index
    %c0_3 = arith.constant 0 : index
    %2 = vector.load %arg2[%c0_2, %c0_3] : memref<2x128xf32, #tpu.memory_space<vmem>>, vector<1x128xf32>
    %3 = vector.broadcast %0 : vector<32x1xf32> to vector<32x128xf32>
    %4 = vector.broadcast %2 : vector<1x128xf32> to vector<32x128xf32>
    %5 = arith.mulf %3, %4 : vector<32x128xf32>
    %c1_4 = arith.constant 1 : index
    %c0_5 = arith.constant 0 : index
    %6 = vector.load %arg2[%c1_4, %c0_5] : memref<2x128xf32, #tpu.memory_space<vmem>>, vector<1x128xf32>
    %7 = vector.broadcast %1 : vector<32x1xf32> to vector<32x128xf32>
    %8 = vector.broadcast %6 : vector<1x128xf32> to vector<32x128xf32>
    %9 = arith.mulf %7, %8 : vector<32x128xf32>
    %10 = arith.addf %5, %9 : vector<32x128xf32>
    %c0_6 = arith.constant 0 : index
    %c0_7 = arith.constant 0 : index
    %11 = vector.load %arg3[%c0_6, %c0_7] : memref<1x128xf32, #tpu.memory_space<vmem>>, vector<1x128xf32>
    %12 = vector.broadcast %11 : vector<1x128xf32> to vector<32x128xf32>
    %13 = arith.addf %10, %12 : vector<32x128xf32>
    %14 = math.sin %13 : vector<32x128xf32>
    %c0_8 = arith.constant 0 : index
    %c0_9 = arith.constant 0 : index
    %15 = vector.load %arg4[%c0_8, %c0_9] : memref<32x256xf32, #tpu.memory_space<vmem>>, vector<32x128xf32>
    tpu.vector_store %arg4[%c0_8, %c0_9], %14 {strides = array<i32>} : memref<32x256xf32, #tpu.memory_space<vmem>>, vector<32x128xf32>,
    %16 = math.cos %13 : vector<32x128xf32>
    %c0_10 = arith.constant 0 : index
    %c128 = arith.constant 128 : index
    %17 = vector.load %arg4[%c0_10, %c128] : memref<32x256xf32, #tpu.memory_space<vmem>>, vector<32x128xf32>
    tpu.vector_store %arg4[%c0_10, %c128], %16 {strides = array<i32>} : memref<32x256xf32, #tpu.memory_space<vmem>>, vector<32x128xf32>,
    return
  }
  func.func @transform_0(%arg0: i32) -> (i32, i32) {
    %c0_i32 = arith.constant 0 : i32
    %c0_i32_0 = arith.constant 0 : i32
    return %arg0, %c0_i32 : i32, i32
  }
  func.func @transform_1(%arg0: i32) -> (i32, i32) {
    %c0_i32 = arith.constant 0 : i32
    %c0_i32_0 = arith.constant 0 : i32
    %c0_i32_1 = arith.constant 0 : i32
    return %c0_i32, %c0_i32_0 : i32, i32
  }
  func.func @transform_2(%arg0: i32) -> (i32, i32) {
    %c0_i32 = arith.constant 0 : i32
    %c0_i32_0 = arith.constant 0 : i32
    %c0_i32_1 = arith.constant 0 : i32
    return %c0_i32, %c0_i32_0 : i32, i32
  }
  func.func @transform_3(%arg0: i32) -> (i32, i32) {
    %c0_i32 = arith.constant 0 : i32
    %c0_i32_0 = arith.constant 0 : i32
    return %arg0, %c0_i32 : i32, i32
  }
}

</mosaic_0001>

<bundles_post_ra>
// kernel: tpu_custom_call.1
= control target key start
LH: loop header
LB: loop body
LE: loop exit
PB: predicated region body
PF: predicated region fallthrough
CT: control target
= control target key end

     0   :  { %v1044_v2 = vmov 0   ;;  %s1399_s0 = inlined_call_operand.vmem [shape: f32[32,2], index: 0, kind: input, shape index: {}]   ;;  %s1400_s1 = inlined_call_operand.vmem [shape: f32[2,128], index: 1, kind: input, shape index: {}]   ;;  %s1401_s2 = inlined_call_operand.vmem [shape: f32[1,128], index: 2, kind: input, shape index: {}]   ;;  %s1402_s3 = inlined_call_operand.hbm [shape: f32[32,256], index: 3, kind: output, shape index: {}]  }
   0x1   :  { %v17_v0 = vld [vmem:[%s1399_s0 + $0x10] sm:$0xff]  ;;  %v15_v1 = vld [vmem:[%s1399_s0] sm:$0xff]  ;;  %1003 = vset.pattern.permute.xlu1 %v1044_v2  ;;  %1002 = vset.pattern.permute.xlu0 %v1044_v2 }
   0x2   :  { %8 = vsyncpa [#allocation3], 0  ;;  %32 = vperm.xlu1 %1003, %v17_v0   ;;  %22 = vperm.xlu0 %1002, %v15_v1   ;;  %v18_v3 = vld [vmem:[%s1399_s0 + $0x18] sm:$0xff]  ;;  %v16_v4 = vld [vmem:[%s1399_s0 + $0x8] sm:$0xff]  ;;  %v1045_v5 = vmov 1  }
   0x3   :  { %v940_v8 = vld [vmem:[%s1400_s1] ss:$0 sm:$0xff]  ;;  %v941_v12 = vld [vmem:[%s1400_s1 + $0x1] ss:$0 sm:$0xff]  ;;  %v1046_v57 = vmov 683565275  }
   0x4   :  { %v942_v19 = vld [vmem:[%s1401_s2] ss:$0 sm:$0xff]  ;;  %v1047_v61 = vmov 2475754826   ;;  %v1048_v63 = vmov 2131351028  }
   0x5   :  { %s1052_s1 = smov [#allocation2]  }
   0x6   :  { %37 = vperm.xlu1 %1003, %v18_v3   ;;  %27 = vperm.xlu0 %1002, %v16_v4   ;;  %s929_s2 = sshll.u32 %s1052_s1, 4  ;;  %s930_s2 = int_to_ptr.vmem [resolvable:$true] %s929_s2 }
   0x7   :  { %s1022_s25 = scalar_lea.vmem %s930_s2, 1024  ;;  %p1027_p1 = scmp.lt.s32.totalorder %s930_s2, %s930_s2 }
   0x8   :  { %p1023_p0 = scmp.ne.s32.totalorder %s930_s2, %s1022_s25  ;;  %p1028_p2 = scmp.lt.s32.totalorder %s1022_s25, %s1022_s25 }
   0xa   :  { %1005 = vset.pattern.permute.xlu1 %v1045_v5  ;;  %1004 = vset.pattern.permute.xlu0 %v1045_v5  ;;  %p1029_p3 = por %p1028_p2, %p1027_p1 }
   0xb   :  { %54 = vperm.xlu1 %1005, %v16_v4   ;;  %50 = vperm.xlu0 %1004, %v15_v1   ;;  %v1049_v1 = vmov 2102212464  }
   0xc   :  { %p1030_p4 = pnand %p1029_p3, %p1023_p0 }
   0xf   :  { %58 = vperm.xlu1 %1005, %v17_v0   ;;  %62 = vperm.xlu0 %1004, %v18_v3   ;;  %v1050_v3 = vmov 920167782  }
  0x7d   :  { %v33_v6 = vpop.permute.xlu1 %32  ;;  %v23_v7 = vpop.permute.xlu0 %22 }
  0x7e   :  { %v44_v15 = vmul.f32 %v940_v8, %v23_v7  ;;  %v46_v28 = vmul.f32 %v940_v8, %v33_v6 }
  0x81   :  { %v38_v9 = vpop.permute.xlu1 %37  ;;  %v28_v10 = vpop.permute.xlu0 %27 }
  0x82   :  { %v47_v11 = vmul.f32 %v940_v8, %v38_v9  ;;  %v45_v16 = vmul.f32 %v940_v8, %v28_v10  ;;  %v1051_v10 = vmov 1326507024  }
  0x86   :  { %v55_v13 = vpop.permute.xlu1 %54  ;;  %v51_v14 = vpop.permute.xlu0 %50 }
  0x87   :  { %v70_v17 = vmul.f32 %v941_v12, %v55_v13  ;;  %v69_v18 = vmul.f32 %v941_v12, %v51_v14 }
  0x89   :  { %v74_v20 = vadd.f32 %v70_v17, %v45_v16  ;;  %v73_v21 = vadd.f32 %v69_v18, %v44_v15 }
  0x8a   :  { %v59_v22 = vpop.permute.xlu1 %58  ;;  %v63_v23 = vpop.permute.xlu0 %62 }
  0x8b   :  { %v1096_v24 = vadd.f32 %v942_v19, %v74_v20  ;;  %v1098_v25 = vadd.f32 %v942_v19, %v73_v21  ;;  %v71_v26 = vmul.f32 %v941_v12, %v59_v22  ;;  %v72_v27 = vmul.f32 %v941_v12, %v63_v23 }
  0x8d   :  { %v192_v29 = vand.u32 2147483647, %v1096_v24  ;;  %v195_v30 = vand.u32 2139095040, %v1096_v24  ;;  %v88_v31 = vand.u32 2147483647, %v1098_v25  ;;  %v91_v32 = vand.u32 2139095040, %v1098_v25 }
  0x8e   :  { %v75_v34 = vadd.f32 %v71_v26, %v46_v28  ;;  %v76_v38 = vadd.f32 %v72_v27, %v47_v11  ;;  %vm194_vm13 = vcmp.lt.s32.totalorder %v1096_v24, 0 }
  0x8f   :  { %v196_v33 = vshrl.u32 %v195_v30, 23  ;;  %v199_v35 = vand.u32 8388607, %v192_v29  ;;  %v92_v36 = vshrl.u32 %v91_v32, 23  ;;  %v95_v37 = vand.u32 8388607, %v88_v31 }
  0x90   :  { %v1108_v40 = vadd.f32 %v942_v19, %v75_v34  ;;  %v1110_v42 = vadd.f32 %v942_v19, %v76_v38  ;;  %vm1220_vm15 = vcmp.le.f32.partialorder %v192_v29, 0.7853982 }
  0x91   :  { %v947_v39 = vadd.s32 4294967169, %v196_v33  ;;  %v943_v41 = vadd.s32 4294967169, %v92_v36  ;;  %v200_v44 = vor.u32 8388608, %v199_v35  ;;  %v96_v45 = vor.u32 8388608, %v95_v37 }
  0x92   :  { %v299_v47 = vand.u32 2139095040, %v1108_v40 }
  0x93   :  { %v202_v43 = vadd.s32 1, %v947_v39  ;;  %v98_v46 = vadd.s32 1, %v943_v41  ;;  %v1113_v53 = vshll.u32 %v200_v44, 8  ;;  %v1117_v55 = vshll.u32 %v96_v45, 8 }
  0x94   :  { %v300_v49 = vshrl.u32 %v299_v47, 23 }
  0x95   :  { %vm203_vm0 = vcmp.gt.s32.totalorder %v202_v43, 0  ;;  %vm99_vm1 = vcmp.gt.s32.totalorder %v98_v46, 0 }
  0x96   :  { %v204_v48 = vsel %vm203_vm0, %v202_v43, 0  ;;  %v100_v52 = vsel %vm99_vm1, %v98_v46, 0  ;;  %v1120_v60 = vadd.s32 4294967169, %v300_v49 }
  0x97   :  { %v205_v50 = vshrl.u32 %v204_v48, 5  ;;  %v206_v51 = vand.u32 31, %v204_v48  ;;  %v1115_v54 = vshrl.u32 %v100_v52, 5  ;;  %v102_v59 = vand.u32 31, %v100_v52 }
  0x99   :  { %v207_v56 = vsub.s32 32, %v206_v51  ;;  %v209_v58 = vshll.u32 %v1046_v57, %v206_v51  ;;  %v212_v62 = vshll.u32 %v1047_v61, %v206_v51  ;;  %v215_v0 = vshll.u32 %v1048_v63, %v206_v51 }
  0x9a   :  { %v218_v2 = vshll.u32 %v1049_v1, %v206_v51  ;;  %v221_v4 = vshll.u32 %v1050_v3, %v206_v51  ;;  %vm224_vm2 = vcmp.lt.s32.totalorder %v205_v50, 1  ;;  %vm225_vm3 = vcmp.lt.s32.totalorder %v205_v50, 2 }
  0x9b   :  { %v210_v5 = vshrl.u32 %v1047_v61, %v207_v56  ;;  %v213_v6 = vshrl.u32 %v1048_v63, %v207_v56  ;;  %v216_v7 = vshrl.u32 %v1049_v1, %v207_v56  ;;  %v208_v8 = vshrl.u32 %v1046_v57, %v207_v56 }
  0x9c   :  { %v219_v9 = vshrl.u32 %v1050_v3, %v207_v56  ;;  %v222_v11 = vshrl.u32 %v1051_v10, %v207_v56  ;;  %v103_v15 = vsub.s32 32, %v102_v59  ;;  %vm226_vm4 = vcmp.lt.s32.totalorder %v205_v50, 3 }
  0x9d   :  { %v211_v12 = vor.u32 %v210_v5, %v209_v58  ;;  %v214_v13 = vor.u32 %v213_v6, %v212_v62  ;;  %v217_v14 = vor.u32 %v216_v7, %v215_v0  ;;  %vm227_vm5 = vcmp.lt.s32.totalorder %v205_v50, 4 }
  0x9e   :  { %v220_v16 = vor.u32 %v219_v9, %v218_v2  ;;  %v223_v17 = vor.u32 %v222_v11, %v221_v4  ;;  %v105_v27 = vshll.u32 %v1046_v57, %v102_v59  ;;  %v106_v32 = vshrl.u32 %v1047_v61, %v103_v15 }
  0x9f   :  { %v228_v18 = vsel %vm224_vm2, %v208_v8, %v211_v12  ;;  %v229_v19 = vsel %vm227_vm5, %v217_v14, 2102212464  ;;  %v232_v20 = vsel %vm224_vm2, %v211_v12, %v214_v13  ;;  %v236_v21 = vsel %vm224_vm2, %v214_v13, %v217_v14 }
  0xa0   :  { %v230_v22 = vsel %vm226_vm4, %v214_v13, %v229_v19  ;;  %v233_v23 = vsel %vm227_vm5, %v220_v16, 920167782  ;;  %v237_v26 = vsel %vm227_vm5, %v223_v17, 1326507024  ;;  %v108_v33 = vshll.u32 %v1047_v61, %v102_v59 }
  0xa1   :  { %v234_v28 = vsel %vm226_vm4, %v217_v14, %v233_v23  ;;  %v238_v30 = vsel %vm226_vm4, %v220_v16, %v237_v26  ;;  %v231_v34 = vsel %vm225_vm3, %v228_v18, %v230_v22  ;;  %v109_v37 = vshrl.u32 %v1048_v63, %v103_v15 }
  0xa2   :  { %v235_v35 = vsel %vm225_vm3, %v232_v20, %v234_v28  ;;  %v239_v36 = vsel %vm225_vm3, %v236_v21, %v238_v30  ;;  %v107_v44 = vor.u32 %v106_v32, %v105_v27  ;;  %v111_v46 = vshll.u32 %v1048_v63, %v102_v59 }
  0xa3   :  { %v1143_v38 = vmul.u32.u64.low %v1113_v53, %v239_v36  ;;  %v1144_v39 = vmul.u32.u64.high %v1113_v53, %v239_v36, %v1143_v38  ;;  %v1147_v41 = vmul.u32.u64.low %v1113_v53, %v235_v35  ;;  %v1148_v43 = vmul.u32.u64.high %v1113_v53, %v235_v35, %v1147_v41 }
  0xa4   :  { %v110_v45 = vor.u32 %v109_v37, %v108_v33  ;;  %v112_v47 = vshrl.u32 %v1049_v1, %v103_v15  ;;  %v104_v48 = vshrl.u32 %v1046_v57, %v103_v15  ;;  %v114_v49 = vshll.u32 %v1049_v1, %v102_v59 }
  0xa5   :  { %v115_v50 = vshrl.u32 %v1050_v3, %v103_v15  ;;  %v118_v51 = vshrl.u32 %v1051_v10, %v103_v15  ;;  %v247_v52 = vmul.u32 %v1113_v53, %v231_v34  ;;  %v117_v58 = vshll.u32 %v1050_v3, %v102_v59 }
  0xa6   :  { %v113_v56 = vor.u32 %v112_v47, %v111_v46  ;;  %vm120_vm6 = vcmp.lt.s32.totalorder %v1115_v54, 1  ;;  %vm249_vm7 = vc.u32 %v1144_v39, %v1147_v41  ;;  %v250_v62 = vadd.s32 1, %v1148_v43 }
  0xa7   :  { %v116_v0 = vor.u32 %v115_v50, %v114_v49  ;;  %vm121_vm8 = vcmp.lt.s32.totalorder %v1115_v54, 2  ;;  %v119_v2 = vor.u32 %v118_v51, %v117_v58  ;;  %vm122_vm9 = vcmp.lt.s32.totalorder %v1115_v54, 3 }
  0xa8   :  { %vm123_vm10 = vcmp.lt.s32.totalorder %v1115_v54, 4  ;;  %v128_v4 = vsel %vm120_vm6, %v107_v44, %v110_v45  ;;  %v251_v53 = vsel %vm249_vm7, %v250_v62, %v1148_v43  ;;  %v132_v6 = vsel %vm120_vm6, %v110_v45, %v113_v56 }
  0xa9   :  { %v125_v5 = vsel %vm123_vm10, %v113_v56, 2102212464  ;;  %v129_v59 = vsel %vm123_vm10, %v116_v0, 920167782  ;;  %v252_v7 = vadd.s32 %v251_v53, %v247_v52  ;;  %v124_v8 = vsel %vm120_vm6, %v104_v48, %v107_v44 }
  0xaa   :  { %v130_v9 = vsel %vm122_vm9, %v113_v56, %v129_v59  ;;  %v133_v11 = vsel %vm123_vm10, %v119_v2, 1326507024  ;;  %v126_v12 = vsel %vm122_vm9, %v110_v45, %v125_v5  ;;  %v306_v15 = vadd.s32 1, %v1120_v60 }
  0xab   :  { %v131_v13 = vsel %vm121_vm8, %v128_v4, %v130_v9  ;;  %v134_v14 = vsel %vm122_vm9, %v116_v0, %v133_v11  ;;  %v253_v16 = vadd.s32 536870912, %v252_v7  ;;  %v296_v22 = vand.u32 2147483647, %v1108_v40 }
  0xac   :  { %v135_v17 = vsel %vm121_vm8, %v132_v6, %v134_v14  ;;  %v1173_v18 = vmul.u32.u64.low %v1117_v55, %v131_v13  ;;  %v1174_v19 = vmul.u32.u64.high %v1117_v55, %v131_v13, %v1173_v18  ;;  %vm307_vm11 = vcmp.gt.s32.totalorder %v306_v15, 0 }
  0xad   :  { %v1177_v20 = vmul.u32.u64.low %v1117_v55, %v135_v17  ;;  %v1178_v21 = vmul.u32.u64.high %v1117_v55, %v135_v17, %v1177_v20  ;;  %v254_v23 = vshrl.u32 %v253_v16, 30  ;;  %v127_v26 = vsel %vm121_vm8, %v124_v8, %v126_v12 }
  0xae   :  { %v308_v60 = vsel %vm307_vm11, %v306_v15, 0  ;;  %v146_v28 = vadd.s32 1, %v1174_v19  ;;  %v143_v32 = vmul.u32 %v1117_v55, %v127_v26  ;;  %v303_v33 = vand.u32 8388607, %v296_v22 }
  0xaf   :  { %v255_v27 = vshll.u32 %v254_v23, 30  ;;  %v310_v30 = vand.u32 31, %v308_v60  ;;  %vm145_vm12 = vc.u32 %v1178_v21, %v1173_v18  ;;  %v403_v45 = vand.u32 2139095040, %v1110_v42 }
  0xb0   :  { %v147_v35 = vsel %vm145_vm12, %v146_v28, %v1174_v19  ;;  %v304_v43 = vor.u32 8388608, %v303_v33  ;;  %v278_v46 = vsub.s32 4, %v254_v23  ;;  %v248_v49 = vadd.s32 %v1147_v41, %v1144_v39 }
  0xb1   :  { %v256_v34 = vsub.s32 %v252_v7, %v255_v27  ;;  %v148_v36 = vadd.s32 %v147_v35, %v143_v32  ;;  %v311_v38 = vsub.s32 32, %v310_v30  ;;  %v1197_v51 = vshrl.u32 %v308_v60, 5 }
  0xb2   :  { %v1199_v52 = vshll.u32 %v304_v43, 8  ;;  %v313_v58 = vshll.u32 %v1046_v57, %v310_v30  ;;  %v404_v0 = vshrl.u32 %v403_v45, 23  ;;  %v279_v2 = vsel %vm194_vm13, %v278_v46, %v254_v23 }
  0xb3   :  { %v258_v37 = vsub.s32 0, %v256_v34  ;;  %v149_v54 = vadd.s32 536870912, %v148_v36  ;;  %v314_v48 = vshrl.u32 %v1047_v61, %v311_v38  ;;  %v317_v62 = vshrl.u32 %v1048_v63, %v311_v38 }
  0xb4   :  { %v144_v4 = vadd.s32 %v1173_v18, %v1178_v21  ;;  %v323_v39 = vshrl.u32 %v1050_v3, %v311_v38  ;;  %v316_v5 = vshll.u32 %v1047_v61, %v310_v30  ;;  %v320_v59 = vshrl.u32 %v1049_v1, %v311_v38 }
  0xb5   :  { %v948_v44 = vmin.u32 %v258_v37, %v256_v34  ;;  %v1190_v47 = vshrl.u32 %v149_v54, 30  ;;  %v315_v41 = vor.u32 %v314_v48, %v313_v58  ;;  %v322_v8 = vshll.u32 %v1049_v1, %v310_v30 }
  0xb6   :  { %v326_v9 = vshrl.u32 %v1051_v10, %v311_v38  ;;  %v318_v13 = vor.u32 %v317_v62, %v316_v5  ;;  %v319_v14 = vshll.u32 %v1048_v63, %v310_v30  ;;  %v312_v16 = vshrl.u32 %v1046_v57, %v311_v38 }
  0xb7   :  { %v260_v55 = vclz %v948_v44  ;;  %v151_v50 = vshll.u32 %v1190_v47, 30  ;;  %v324_v17 = vor.u32 %v323_v39, %v322_v8  ;;  %v325_v18 = vshll.u32 %v1050_v3, %v310_v30 }
  0xb8   :  { %v321_v23 = vor.u32 %v320_v59, %v319_v14  ;;  %vm328_vm0 = vcmp.lt.s32.totalorder %v1197_v51, 1  ;;  %vm329_vm1 = vcmp.lt.s32.totalorder %v1197_v51, 2  ;;  %vm331_vm2 = vcmp.lt.s32.totalorder %v1197_v51, 4 }
  0xb9   :  { %v949_v56 = vadd.s32 4294967294, %v260_v55  ;;  %v1206_v53 = vsub.s32 %v148_v36, %v151_v50  ;;  %v327_v27 = vor.u32 %v326_v9, %v325_v18  ;;  %v336_v30 = vsel %vm328_vm0, %v315_v41, %v318_v13 }
  0xba   :  { %vm330_vm3 = vcmp.lt.s32.totalorder %v1197_v51, 3  ;;  %v337_v35 = vsel %vm331_vm2, %v324_v17, 920167782  ;;  %v333_v36 = vsel %vm331_vm2, %v321_v23, 2102212464  ;;  %v340_v38 = vsel %vm328_vm0, %v318_v13, %v321_v23 }
  0xbb   :  { %vm950_vm14 = vcmp.lt.s32.totalorder %v949_v56, 0  ;;  %v154_v7 = vsub.s32 0, %v1206_v53  ;;  %v338_v37 = vsel %vm330_vm3, %v321_v23, %v337_v35  ;;  %v341_v44 = vsel %vm331_vm2, %v327_v27, 1326507024 }
  0xbc   :  { %v263_v6 = vsel %vm950_vm14, 0, %v949_v56  ;;  %v339_v43 = vsel %vm329_vm1, %v336_v30, %v338_v37  ;;  %v342_v55 = vsel %vm330_vm3, %v324_v17, %v341_v44  ;;  %v955_v48 = vadd.s32 4294967169, %v404_v0 }
  0xbd   :  { %v264_v11 = vsub.s32 32, %v263_v6  ;;  %v268_v12 = vsub.s32 4294967266, %v263_v6  ;;  %v944_v15 = vmin.u32 %v154_v7, %v1206_v53  ;;  %v265_v19 = vshll.u32 %v256_v34, %v263_v6 }
  0xbe   :  { %v332_v34 = vsel %vm328_vm0, %v312_v16, %v315_v41  ;;  %v334_v56 = vsel %vm330_vm3, %v318_v13, %v333_v36  ;;  %v343_v58 = vsel %vm329_vm1, %v340_v38, %v342_v55  ;;  %v281_v9 = vsel %vm1220_vm15, 0, %v279_v2 }
  0xbf   :  { %v266_v20 = vshrl.u32 %v248_v49, %v264_v11  ;;  %v269_v21 = vadd.s32 127, %v268_v12  ;;  %v156_v60 = vclz %v944_v15  ;;  %v174_v11 = vsub.s32 4, %v1190_v47 }
  0xc0   :  { %v1240_v41 = vmul.u32.u64.low %v1199_v52, %v343_v58  ;;  %v1241_v5 = vmul.u32.u64.high %v1199_v52, %v343_v58, %v1240_v41  ;;  %v1244_v7 = vmul.u32.u64.low %v1199_v52, %v339_v43  ;;  %v1245_v0 = vmul.u32.u64.high %v1199_v52, %v339_v43, %v1244_v7 }
  0xc1   :  { %v267_v28 = vor.u32 %v266_v20, %v265_v19  ;;  %v270_v32 = vshll.u32 %v269_v21, 23  ;;  %v945_v33 = vadd.s32 4294967294, %v156_v60  ;;  %v410_v12 = vadd.s32 1, %v955_v48 }
  0xc2   :  { %vm90_vm5 = vcmp.lt.s32.totalorder %v1098_v25, 0  ;;  %vm353_vm6 = vc.u32 %v1241_v5, %v1244_v7  ;;  %v400_v15 = vand.u32 2147483647, %v1110_v42  ;;  %v285_v16 = vadd.s32 3, %v281_v9 }
  0xc3   :  { %v271_v29 = vor.u32 4788187, %v270_v32  ;;  %v274_v54 = vcvt.s32.f32 %v267_v28  ;;  %vm946_vm4 = vcmp.lt.s32.totalorder %v945_v33, 0  ;;  %vm411_vm7 = vcmp.gt.s32.totalorder %v410_v12, 0 }
  0xc4   :  { %v159_v46 = vsel %vm946_vm4, 0, %v945_v33  ;;  %v354_v18 = vadd.s32 1, %v1245_v0  ;;  %v175_v51 = vsel %vm90_vm5, %v174_v11, %v1190_v47  ;;  %v412_v20 = vsel %vm411_vm7, %v410_v12, 0 }
  0xc5   :  { %v272_v45 = vand.u32 2147483647, %v271_v29  ;;  %v160_v49 = vsub.s32 32, %v159_v46  ;;  %v164_v50 = vsub.s32 4294967266, %v159_v46  ;;  %v161_v39 = vshll.u32 %v1206_v53, %v159_v46 }
  0xc6   :  { %v355_v60 = vsel %vm353_vm6, %v354_v18, %v1245_v0  ;;  %vm1270_vm8 = vcmp.le.f32.partialorder %v88_v31, 0.7853982  ;;  %v1276_v28 = vand.u32 8388607, %v400_v15  ;;  %v414_v47 = vand.u32 31, %v412_v20 }
  0xc7   :  { %v275_v62 = vmul.f32 %v274_v54, %v272_v45  ;;  %v162_v59 = vshrl.u32 %v144_v4, %v160_v49  ;;  %v165_v6 = vadd.s32 127, %v164_v50  ;;  %v335_v4 = vsel %vm329_vm1, %v332_v34, %v334_v56 }
  0xc8   :  { %v351_v19 = vmul.u32 %v1199_v52, %v335_v4  ;;  %v1278_v32 = vand.u32 3, %v285_v16  ;;  %v1280_v52 = vand.u32 3, %v281_v9  ;;  %v177_v33 = vsel %vm1270_vm8, 0, %v175_v51 }
  0xc9   :  { %v276_v8 = vxor.u32 2147483648, %v275_v62  ;;  %v163_v53 = vor.u32 %v162_v59, %v161_v39  ;;  %v166_v13 = vshll.u32 %v165_v6, 23  ;;  %v1284_v35 = vshrl.u32 %v412_v20, 5 }
  0xca   :  { %v356_v27 = vadd.s32 %v355_v60, %v351_v19  ;;  %v415_v31 = vsub.s32 32, %v414_v47  ;;  %v417_v29 = vshll.u32 %v1046_v57, %v414_v47  ;;  %v420_v37 = vshll.u32 %v1047_v61, %v414_v47 }
  0xcb   :  { %v277_v14 = vsel %vm194_vm13, %v276_v8, %v275_v62  ;;  %v167_v17 = vor.u32 4788187, %v166_v13  ;;  %v170_v23 = vcvt.s32.f32 %v163_v53  ;;  %v423_v38 = vshll.u32 %v1048_v63, %v414_v47 }
  0xcc   :  { %v280_v2 = vsel %vm1220_vm15, %v1096_v24, %v277_v14  ;;  %v357_v34 = vadd.s32 536870912, %v356_v27  ;;  %v426_v54 = vshll.u32 %v1049_v1, %v414_v47  ;;  %v418_v44 = vshrl.u32 %v1047_v61, %v415_v31 }
  0xcd   :  { %1006 = vcosq.f32 %v280_v2  ;;  %v168_v21 = vand.u32 2147483647, %v167_v17  ;;  %v421_v45 = vshrl.u32 %v1048_v63, %v415_v31  ;;  %v429_v46 = vshll.u32 %v1050_v3, %v414_v47 }
  0xce   :  { %1008 = vsinq.f32 %v280_v2  ;;  %v1290_v43 = vshrl.u32 %v357_v34, 30  ;;  %vm709_vm9 = vcmp.eq.s32.totalorder %v1280_v52, 2  ;;  %v424_v48 = vshrl.u32 %v1049_v1, %v415_v31 }
  0xcf   :  { %v171_v30 = vmul.f32 %v170_v23, %v168_v21  ;;  %v427_v49 = vshrl.u32 %v1050_v3, %v415_v31  ;;  %v430_v50 = vshrl.u32 %v1051_v10, %v415_v31  ;;  %vm706_vm10 = vcmp.eq.s32.totalorder %v1280_v52, 0 }
  0xd0   :  { %v359_v63 = vshll.u32 %v1290_v43, 30  ;;  %v416_v56 = vshrl.u32 %v1046_v57, %v415_v31  ;;  %v419_v58 = vor.u32 %v418_v44, %v417_v29  ;;  %vm287_vm11 = vcmp.lt.s32.totalorder %v1278_v32, 2 }
  0xd1   :  { %v172_v36 = vxor.u32 2147483648, %v171_v30  ;;  %vm705_vm12 = vcmp.lt.s32.totalorder %v1280_v52, 2  ;;  %v422_v1 = vor.u32 %v421_v45, %v420_v37  ;;  %v425_v3 = vor.u32 %v424_v48, %v423_v38 }
  0xd2   :  { %v428_v62 = vor.u32 %v427_v49, %v426_v54  ;;  %vm284_vm13 = vweird.f32 %v1096_v24  ;;  %v1310_v10 = vsub.s32 %v356_v27, %v359_v63  ;;  %v431_v39 = vor.u32 %v430_v50, %v429_v46 }
  0xd3   :  { %v173_v55 = vsel %vm90_vm5, %v172_v36, %v171_v30  ;;  %vm432_vm14 = vcmp.lt.s32.totalorder %v1284_v35, 1  ;;  %v181_v41 = vadd.s32 3, %v177_v33  ;;  %vm435_vm15 = vcmp.lt.s32.totalorder %v1284_v35, 4 }
  0xd4   :  { %v176_v61 = vsel %vm1270_vm8, %v1098_v25, %v173_v55  ;;  %v436_v57 = vsel %vm432_vm14, %v416_v56, %v419_v58  ;;  %v440_v59 = vsel %vm432_vm14, %v419_v58, %v422_v1  ;;  %vm288_vm0 = vcmp.eq.s32.totalorder %v1278_v32, 0 }
  0xd5   :  { %1010 = vcosq.f32 %v176_v61  ;;  %v362_v6 = vsub.s32 0, %v1310_v10  ;;  %vm434_vm1 = vcmp.lt.s32.totalorder %v1284_v35, 3  ;;  %v437_v0 = vsel %vm435_vm15, %v425_v3, 2102212464 }
  0xd6   :  { %1012 = vsinq.f32 %v176_v61  ;;  %v1319_v9 = vand.u32 3, %v177_v33  ;;  %v408_v11 = vor.u32 8388608, %v1276_v28  ;;  %v438_v12 = vsel %vm434_vm1, %v422_v1, %v437_v0 }
  0xd7   :  { %v444_v53 = vsel %vm432_vm14, %v422_v1, %v425_v3  ;;  %vm291_vm2 = vcmp.eq.s32.totalorder %v1278_v32, 2  ;;  %v952_v14 = vmin.u32 %v362_v6, %v1310_v10  ;;  %vm433_vm3 = vcmp.lt.s32.totalorder %v1284_v35, 2 }
  0xd8   :  { %v182_v16 = vand.u32 3, %v181_v41  ;;  %v439_v17 = vsel %vm433_vm3, %v436_v57, %v438_v12  ;;  %v441_v18 = vsel %vm435_vm15, %v428_v62, 920167782  ;;  %v445_v21 = vsel %vm435_vm15, %v431_v39, 1326507024 }
  0xd9   :  { %v364_v20 = vclz %v952_v14  ;;  %vm603_vm4 = vcmp.eq.s32.totalorder %v1319_v9, 0  ;;  %v448_v26 = vshll.u32 %v408_v11, 8  ;;  %vm602_vm5 = vcmp.lt.s32.totalorder %v1319_v9, 2 }
  0xda   :  { %v1007_v8 = vpop.eup %1006  ;;  %v442_v30 = vsel %vm434_vm1, %v425_v3, %v441_v18  ;;  %vm180_vm6 = vweird.f32 %v1098_v25  ;;  %v446_v52 = vsel %vm434_vm1, %v428_v62, %v445_v21  ;;  %vm606_vm8 = vcmp.eq.s32.totalorder %v1319_v9, 2 }
  0xdb   :  { %v1009_v13 = vpop.eup %1008  ;;  %v292_v4 = vxor.u32 2147483648, %v1007_v8  ;;  %v953_v47 = vadd.s32 4294967294, %v364_v20  ;;  %v443_v32 = vsel %vm433_vm3, %v440_v59, %v442_v30  ;;  %v447_v31 = vsel %vm433_vm3, %v444_v53, %v446_v52 }
  0xdc   :  { %v289_v2 = vxor.u32 2147483648, %v1009_v13  ;;  %v1358_v29 = vmul.u32.u64.low %v448_v26, %v443_v32  ;;  %v1359_v36 = vmul.u32.u64.high %v448_v26, %v443_v32, %v1358_v29  ;;  %v352_v44 = vadd.s32 %v1244_v7, %v1241_v5 }
  0xdd   :  { %v293_v51 = vsel %vm291_vm2, %v292_v4, %v1009_v13  ;;  %v711_v19 = vsel %vm709_vm9, %v292_v4, %v1009_v13  ;;  %vm954_vm7 = vcmp.lt.s32.totalorder %v953_v47, 0  ;;  %vm183_vm9 = vcmp.lt.s32.totalorder %v182_v16, 2 }
  0xde   :  { %v290_v23 = vsel %vm288_vm0, %v1007_v8, %v289_v2  ;;  %v708_v60 = vsel %vm706_vm10, %v1007_v8, %v289_v2  ;;  %v367_v24 = vsel %vm954_vm7, 0, %v953_v47  ;;  %vm184_vm10 = vcmp.eq.s32.totalorder %v182_v16, 0 }
  0xdf   :  { %v294_v27 = vsel %vm287_vm11, %v290_v23, %v293_v51  ;;  %v712_v28 = vsel %vm705_vm12, %v708_v60, %v711_v19  ;;  %v1362_v37 = vmul.u32.u64.low %v448_v26, %v447_v31  ;;  %v1363_v38 = vmul.u32.u64.high %v448_v26, %v447_v31, %v1362_v37 }
  0xe0   :  { %v295_v33 = vsel %vm284_vm13, nan, %v294_v27  ;;  %v713_v34 = vsel %vm284_vm13, nan, %v712_v28  ;;  %v368_v45 = vsub.s32 32, %v367_v24  ;;  %v372_v46 = vsub.s32 4294967266, %v367_v24 }
  0xe1   :  { %505 = vst [vmem:[#allocation2 + $0x10] sm:$0xff] %v295_v33  ;;  %921 = vst [vmem:[#allocation2 + $0x18] sm:$0xff] %v713_v34  ;;  %vm187_vm11 = vcmp.eq.s32.totalorder %v182_v16, 2  ;;  %v369_v48 = vshll.u32 %v1310_v10, %v367_v24  ;;  %v458_v63 = vadd.s32 1, %v1359_v36  ;;  %v456_v1 = vadd.s32 %v1358_v29, %v1363_v38 }
  0xe2   :  { %v1011_v54 = vpop.eup %1010  ;;  %v370_v50 = vshrl.u32 %v352_v44, %v368_v45  ;;  %v373_v61 = vadd.s32 127, %v372_v46  ;;  %vm457_vm12 = vc.u32 %v1363_v38, %v1358_v29  ;;  %v455_v41 = vmul.u32 %v448_v26, %v439_v17 }
  0xe3   :  { %v1013_v55 = vpop.eup %1012  ;;  %v188_v35 = vxor.u32 2147483648, %v1011_v54  ;;  %v459_v57 = vsel %vm457_vm12, %v458_v63, %v1359_v36  ;;  %vm298_vm13 = vcmp.lt.s32.totalorder %v1108_v40, 0  ;;  %v382_v14 = vsub.s32 4, %v1290_v43 }
  0xe4   :  { %v185_v49 = vxor.u32 2147483648, %v1013_v55  ;;  %v371_v3 = vor.u32 %v370_v50, %v369_v48  ;;  %v374_v62 = vshll.u32 %v373_v61, 23  ;;  %v460_v8 = vadd.s32 %v459_v57, %v455_v41 }
  0xe5   :  { %v189_v56 = vsel %vm187_vm11, %v188_v35, %v1013_v55  ;;  %v608_v58 = vsel %vm606_vm8, %v188_v35, %v1013_v55  ;;  %vm297_vm14 = vcmp.le.f32.partialorder %v296_v22, 0.7853982  ;;  %v383_v18 = vsel %vm298_vm13, %v382_v14, %v1290_v43 }
  0xe6   :  { %v186_v5 = vsel %vm184_vm10, %v1011_v54, %v185_v49  ;;  %v605_v7 = vsel %vm603_vm4, %v1011_v54, %v185_v49  ;;  %v375_v0 = vor.u32 4788187, %v374_v62  ;;  %v378_v12 = vcvt.s32.f32 %v371_v3 }
  0xe7   :  { %v190_v10 = vsel %vm183_vm9, %v186_v5, %v189_v56  ;;  %v609_v39 = vsel %vm602_vm5, %v605_v7, %v608_v58  ;;  %v461_v53 = vadd.s32 536870912, %v460_v8  ;;  %v385_v20 = vsel %vm297_vm14, 0, %v383_v18 }
  0xe8   :  { %v191_v59 = vsel %vm180_vm6, nan, %v190_v10  ;;  %v610_v6 = vsel %vm180_vm6, nan, %v609_v39  ;;  %v376_v11 = vand.u32 2147483647, %v375_v0  ;;  %v389_v23 = vadd.s32 3, %v385_v20 }
  0xe9   :  { %504 = vst [vmem:[#allocation2] sm:$0xff] %v191_v59  ;;  %920 = vst [vmem:[#allocation2 + $0x8] sm:$0xff] %v610_v6  ;;  %v462_v4 = vshrl.u32 %v461_v53, 30  ;;  %v807_v26 = vand.u32 3, %v385_v20  ;;  %vm388_vm6 = vweird.f32 %v1108_v40  ;;  %vm402_vm7 = vcmp.lt.s32.totalorder %v1110_v42, 0 }
  0xea   :  { %v379_v13 = vmul.f32 %v378_v12, %v376_v11  ;;  %v390_v28 = vand.u32 3, %v389_v23  ;;  %vm401_vm8 = vcmp.le.f32.partialorder %v400_v15, 0.7853982 }
  0xeb   :  { %v463_v2 = vshll.u32 %v462_v4, 30  ;;  %vm808_vm0 = vcmp.lt.s32.totalorder %v807_v26, 2  ;;  %vm812_vm1 = vcmp.eq.s32.totalorder %v807_v26, 2  ;;  %vm809_vm4 = vcmp.eq.s32.totalorder %v807_v26, 0 }
  0xec   :  { %v380_v9 = vxor.u32 2147483648, %v379_v13  ;;  %vm395_vm2 = vcmp.eq.s32.totalorder %v390_v28, 2  ;;  %vm392_vm3 = vcmp.eq.s32.totalorder %v390_v28, 0  ;;  %vm391_vm5 = vcmp.lt.s32.totalorder %v390_v28, 2 }
  0xed   :  { %v464_v17 = vsub.s32 %v460_v8, %v463_v2  ;;  %v486_v63 = vsub.s32 4, %v462_v4 }
  0xee   :  { %v381_v25 = vsel %vm298_vm13, %v380_v9, %v379_v13 }
  0xef   :  { %v384_v16 = vsel %vm297_vm14, %v1108_v40, %v381_v25  ;;  %v466_v51 = vsub.s32 0, %v464_v17  ;;  %v487_v58 = vsel %vm402_vm7, %v486_v63, %v462_v4 }
  0xf0   :  { %1014 = vcosq.f32 %v384_v16 }
  0xf1   :  { %1016 = vsinq.f32 %v384_v16  ;;  %v956_v19 = vmin.u32 %v466_v51, %v464_v17 }
  0xf3   :  { %v468_v21 = vclz %v956_v19 }
  0xf5   :  { %v957_v60 = vadd.s32 4294967294, %v468_v21 }
  0xf7   :  { %vm958_vm15 = vcmp.lt.s32.totalorder %v957_v60, 0 }
  0xf8   :  { %v471_v27 = vsel %vm958_vm15, 0, %v957_v60  ;;  %vm492_vm15 = vweird.f32 %v1110_v42 }
  0xf9   :  { %v472_v47 = vsub.s32 32, %v471_v27  ;;  %v476_v22 = vsub.s32 4294967266, %v471_v27  ;;  %v473_v33 = vshll.u32 %v464_v17, %v471_v27 }
  0xfb   :  { %v474_v34 = vshrl.u32 %v456_v1, %v472_v47  ;;  %v477_v32 = vadd.s32 127, %v476_v22  ;;  %v489_v1 = vsel %vm401_vm8, 0, %v487_v58 }
  0xfc   :  { %v493_v5 = vadd.s32 3, %v489_v1  ;;  %v910_v3 = vand.u32 3, %v489_v1 }
  0xfd   :  { %v1015_v30 = vpop.eup %1014  ;;  %v475_v29 = vor.u32 %v474_v34, %v473_v33  ;;  %v478_v36 = vshll.u32 %v477_v32, 23 }
  0xfe   :  { %v1017_v52 = vpop.eup %1016  ;;  %v396_v31 = vxor.u32 2147483648, %v1015_v30  ;;  %v494_v7 = vand.u32 3, %v493_v5  ;;  %vm915_vm10 = vcmp.eq.s32.totalorder %v910_v3, 2  ;;  %vm912_vm12 = vcmp.eq.s32.totalorder %v910_v3, 0 }
  0xff   :  { %v393_v43 = vxor.u32 2147483648, %v1017_v52  ;;  %v479_v44 = vor.u32 4788187, %v478_v36  ;;  %v482_v49 = vcvt.s32.f32 %v475_v29  ;;  %vm911_vm14 = vcmp.lt.s32.totalorder %v910_v3, 2 }
 0x100   :  { %v397_v24 = vsel %vm395_vm2, %v396_v31, %v1017_v52  ;;  %v814_v37 = vsel %vm812_vm1, %v396_v31, %v1017_v52  ;;  %vm499_vm9 = vcmp.eq.s32.totalorder %v494_v7, 2  ;;  %vm496_vm11 = vcmp.eq.s32.totalorder %v494_v7, 0 }
 0x101   :  { %v394_v38 = vsel %vm392_vm3, %v1015_v30, %v393_v43  ;;  %v811_v54 = vsel %vm809_vm4, %v1015_v30, %v393_v43  ;;  %v480_v48 = vand.u32 2147483647, %v479_v44  ;;  %vm495_vm13 = vcmp.lt.s32.totalorder %v494_v7, 2 }
 0x102   :  { %v398_v45 = vsel %vm391_vm5, %v394_v38, %v397_v24  ;;  %v815_v46 = vsel %vm808_vm0, %v811_v54, %v814_v37 }
 0x103   :  { %v399_v55 = vsel %vm388_vm6, nan, %v398_v45  ;;  %v816_v35 = vsel %vm388_vm6, nan, %v815_v46  ;;  %v483_v50 = vmul.f32 %v482_v49, %v480_v48 }
 0x104   :  { %506 = vst [vmem:[#allocation2 + $0x20] sm:$0xff] %v399_v55  ;;  %922 = vst [vmem:[#allocation2 + $0x28] sm:$0xff] %v816_v35 }
 0x105   :  { %v484_v61 = vxor.u32 2147483648, %v483_v50 }
 0x107   :  { %v485_v56 = vsel %vm402_vm7, %v484_v61, %v483_v50 }
 0x108   :  { %v488_v40 = vsel %vm401_vm8, %v1110_v42, %v485_v56 }
 0x109   :  { %1018 = vcosq.f32 %v488_v40 }
 0x10a   :  { %1020 = vsinq.f32 %v488_v40 }
 0x116   :  { %v1019_v62 = vpop.eup %1018 }
 0x117   :  { %v1021_v10 = vpop.eup %1020  ;;  %v500_v39 = vxor.u32 2147483648, %v1019_v62 }
 0x118   :  { %v497_v41 = vxor.u32 2147483648, %v1021_v10 }
 0x119   :  { %v501_v15 = vsel %vm499_vm9, %v500_v39, %v1021_v10  ;;  %v917_v57 = vsel %vm915_vm10, %v500_v39, %v1021_v10 }
 0x11a   :  { %v498_v59 = vsel %vm496_vm11, %v1019_v62, %v497_v41  ;;  %v914_v6 = vsel %vm912_vm12, %v1019_v62, %v497_v41 }
 0x11b   :  { %v502_v0 = vsel %vm495_vm13, %v498_v59, %v501_v15  ;;  %v918_v8 = vsel %vm911_vm14, %v914_v6, %v917_v57 }
 0x11c   :  { %v503_v11 = vsel %vm492_vm15, nan, %v502_v0  ;;  %v919_v12 = vsel %vm492_vm15, nan, %v918_v8 }
 0x11d   :  { %507 = vst [vmem:[#allocation2 + $0x30] sm:$0xff] %v503_v11  ;;  %923 = vst [vmem:[#allocation2 + $0x38] sm:$0xff] %v919_v12 }
 0x11e   :  { %1033 = shalt.err (!%p1030_p4)
}
 0x11f   :  { %s1053_s26 = smov 256   ;;  %s1054_s27 = smov 16  }
 0x120   :  { %935 = dma.vmem_to_hbm [thread:$0]  %s930_s2, 1024, %s1402_s3, [#allocation3], %s1053_s26, %s1053_s26, %s1054_s27  }
 0x121   :  { %1042 = dma.done.wait [#allocation3], 1024  }
 0x122   :  { %1043 = vsyncadd [#allocation3], 4294966272 }
 0x123   :  { %939 = vsyncpa [#allocation3], 1 }

</bundles_post_ra>
